<compile_context>
chip_gen: v6e
topology: v6e:2x2x1
jax: 0.10.0
libtpu: 0.0.40
codegen_flags: <defaults>
</compile_context>

<pallas_src>
import functools

import jax
import jax.numpy as jnp
from jax import lax
from jax.experimental import pallas as pl
from jax.experimental.pallas import tpu as pltpu


def _identity(v):
    return v


def _vmem_capacity_bytes():
    try:
        return int(pltpu.get_tpu_info().vmem_capacity_bytes)
    except Exception:
        return 128 * 1024 * 1024


def _pick_tm(n, heads, d, x_bytes, w_bytes, has_gres, budget):
    """Largest m-tile (preferring tm == N -> resident weight) fitting the budget."""
    D = heads * d

    def fits(t):
        f = 2 * n * D * x_bytes                  # x slab (double-buffered)
        f += heads * n * d * w_bytes             # LayerNorm scratch
        f += 2 * heads * t * n * w_bytes         # weight tile(s)
        f += 2 * t * 128 * 4                     # bias tile (lane-padded)
        f += 2 * t * D * x_bytes                 # output tile
        if has_gres:
            f += 2 * t * D * x_bytes             # gate_res tile
        f += n * D * 4 + 2 * t * D * 4           # in-kernel f32 temporaries
        return f <= budget

    cands = [n] + [t for t in (4096, 2048, 1024, 512, 256, 128, 64, 32, 16, 8)
                   if t < n and n % t == 0]
    for t in cands:
        if fits(t):
            return t
    return cands[-1]  # best effort for awkward N / tiny budgets


def _epm_kernel(x_ref, gamma_ref, beta_ref, w_ref, b_ref, *rest,
                heads, head_dim, eps, act, has_gate_res, tm, n):
    # x_ref:     (1, N, D)        input dtype, resident for the whole batch elem
    # gamma_ref: (1, D) f32       LayerNorm scale
    # beta_ref:  (1, D) f32       LayerNorm shift
    # w_ref:     (H, Tm, N)       weight m-tile, x's matmul dtype (bf16/f32)
    # b_ref:     (Tm, H) f32      seq bias columns for this m-tile
    # optional gres_ref: (1, Tm, D) input dtype
    # y_ref:     (1, Tm, D)       output, input dtype
    # ln_ref:    (H, N, d)        per-batch LayerNorm scratch (matmul dtype)
    if has_gate_res:
        gres_ref, y_ref, ln_ref = rest
    else:
        y_ref, ln_ref = rest

    mi = pl.program_id(1)

    # LayerNorm once per batch element (mi axis is "arbitrary" -> sequential).
    @pl.when(mi == 0)
    def _():
        xf = x_ref[0].astype(jnp.float32)                     # (N, D)
        mean = jnp.mean(xf, axis=-1, keepdims=True)
        xc = xf - mean
        var = jnp.mean(xc * xc, axis=-1, keepdims=True)
        ln = xc * lax.rsqrt(var + eps)
        ln = ln * gamma_ref[...] + beta_ref[...]              # (N, D) f32
        for h in range(heads):                                # static loop
            ln_ref[h] = ln[:, h * head_dim:(h + 1) * head_dim].astype(ln_ref.dtype)

    # Per-head seq-mixing matmul (MXU, f32 accumulation) + bias.
    outs = []
    for h in range(heads):                                    # static loop
        g = jnp.dot(w_ref[h], ln_ref[h],
                    preferred_element_type=jnp.float32)       # (Tm, d) f32
        g = g + b_ref[:, h:h + 1]                             # (Tm, 1) broadcast
        outs.append(g)
    gate = outs[0] if heads == 1 else jnp.concatenate(outs, axis=-1)  # (Tm, D)

    if has_gate_res:
        gate = gate + gres_ref[0].astype(jnp.float32)
    gate = act(gate)

    # Residual multiply with the rows of x belonging to this m-tile.
    if tm == n:                                               # static check
        res = x_ref[0]
    else:
        start = pl.multiple_of(mi * tm, tm)
        res = x_ref[0, pl.ds(start, tm), :]
    y_ref[0] = (gate * res.astype(jnp.float32)).astype(y_ref.dtype)


def epm_forward(x, weight, bias, ln_gamma, ln_beta, gate_res=None, *,
                heads=1, causal=False, act=None, eps=1e-5, tm=None):
    """EPM forward.

    x:        (B, N, D)                 float dtype (f32 / bf16)
    weight:   (heads, dim_seq, dim_seq)
    bias:     (heads, dim_seq)
    ln_gamma: (D,)   LayerNorm weight
    ln_beta:  (D,)   LayerNorm bias
    gate_res: (B, N, D) or None
    Returns:  (B, N, D) in x.dtype
    """
    B, n, D = x.shape
    assert D % heads == 0
    d = D // heads

    # bf16 inputs -> bf16 weight / LN scratch and bf16 MXU matmul (f32 accum).
    mm_dtype = jnp.bfloat16 if x.dtype == jnp.bfloat16 else jnp.float32

    w = jnp.asarray(weight, jnp.float32)
    b = jnp.asarray(bias, jnp.float32)
    if causal:
        w = w[:, :n, :n]
        b = b[:, :n]
        mask = jnp.triu(jnp.ones((n, n), dtype=jnp.bool_), 1)
        w = jnp.where(mask[None], 0.0, w)                     # masked once in XLA
    assert w.shape == (heads, n, n), (w.shape, (heads, n, n))
    w = w.astype(mm_dtype)
    b_t = b.T                                                 # (n, heads) f32
    gamma2 = jnp.asarray(ln_gamma, jnp.float32).reshape(1, D)
    beta2 = jnp.asarray(ln_beta, jnp.float32).reshape(1, D)

    x_bytes = jnp.dtype(x.dtype).itemsize
    w_bytes = jnp.dtype(mm_dtype).itemsize
    has_gres = gate_res is not None

    # Per-generation VMEM sizing: ~85% of physical, capped at 110 MiB.
    vmem_limit = min(int(_vmem_capacity_bytes() * 0.85), 110 * 1024 * 1024)
    if tm is None:
        tm = _pick_tm(n, heads, d, x_bytes, w_bytes, has_gres,
                      int(vmem_limit * 0.75))
    assert n % tm == 0
    n_mt = n // tm

    kernel = functools.partial(
        _epm_kernel, heads=heads, head_dim=d, eps=float(eps),
        act=(act or _identity), has_gate_res=has_gres, tm=tm, n=n)

    in_specs = [
        pl.BlockSpec((1, n, D), lambda bb, mi: (bb, 0, 0)),        # x slab (per-batch resident)
        pl.BlockSpec((1, D), lambda bb, mi: (0, 0)),               # gamma
        pl.BlockSpec((1, D), lambda bb, mi: (0, 0)),               # beta
        pl.BlockSpec((heads, tm, n), lambda bb, mi: (0, mi, 0)),   # weight (resident if tm == n)
        pl.BlockSpec((tm, heads), lambda bb, mi: (mi, 0)),         # bias columns
    ]
    args = [x, gamma2, beta2, w, b_t]
    if has_gres:
        in_specs.append(pl.BlockSpec((1, tm, D), lambda bb, mi: (bb, mi, 0)))
        args.append(jnp.asarray(gate_res, x.dtype))

    y = pl.pallas_call(
        kernel,
        out_shape=jax.ShapeDtypeStruct((B, n, D), x.dtype),
        grid_spec=pltpu.PrefetchScalarGridSpec(
            num_scalar_prefetch=0,
            grid=(B, n_mt),
            in_specs=in_specs,
            out_specs=pl.BlockSpec((1, tm, D), lambda bb, mi: (bb, mi, 0)),
            scratch_shapes=[pltpu.VMEM((heads, n, d), mm_dtype)],  # per-batch LN
        ),
        compiler_params=pltpu.CompilerParams(
            dimension_semantics=("parallel", "arbitrary"),
            vmem_limit_bytes=vmem_limit),
    )(*args)
    return y


def _reference(x, weight, bias, gamma, beta, gate_res=None, *,
               heads, causal, eps=1e-5, act=None):
    """Pure-JAX reference replicating the PyTorch EPM semantics."""
    B, n, D = x.shape
    d = D // heads
    act = act or _identity
    xf = x.astype(jnp.float32)
    mean = xf.mean(-1, keepdims=True)
    var = ((xf - mean) ** 2).mean(-1, keepdims=True)
    g = (xf - mean) / jnp.sqrt(var + eps) * jnp.asarray(gamma, jnp.float32) \
        + jnp.asarray(beta, jnp.float32)
    w = jnp.asarray(weight, jnp.float32)
    b = jnp.asarray(bias, jnp.float32)
    if causal:
        w = w[:, :n, :n]
        b = b[:, :n]
        mask = jnp.triu(jnp.ones((n, n), bool), 1)
        w = jnp.where(mask[None], 0.0, w)
    g = g.reshape(B, n, heads, d).transpose(0, 2, 1, 3)          # b h n d
    g = jnp.einsum('bhnd,hmn->bhmd', g, w)
    g = g + b[None, :, :, None]
    g = g.transpose(0, 2, 1, 3).reshape(B, n, D)
    if gate_res is not None:
        g = g + gate_res.astype(jnp.float32)
    return (act(g) * xf).astype(x.dtype)


if __name__ == "__main__":
    key = jax.random.PRNGKey(0)
    kx, kw, kb, kg, kbt, kr, kx2, kw2, kb2, kg2, kbt2 = jax.random.split(key, 11)

    # Config A: batch=2, seq=8, dim=32, heads=1.
    B, N, D = 2, 8, 32
    heads = 1
    x = jax.random.normal(kx, (B, N, D), jnp.float32)
    weight = jax.random.normal(kw, (heads, N, N), jnp.float32) * 0.1
    bias = 1.0 + 0.05 * jax.random.normal(kb, (heads, N), jnp.float32)
    ln_gamma = 1.0 + 0.1 * jax.random.normal(kg, (D,), jnp.float32)
    ln_beta = 0.1 * jax.random.normal(kbt, (D,), jnp.float32)
    gate_res = 0.1 * jax.random.normal(kr, (B, N, D), jnp.float32)

    # 1) non-causal, with gate_res
    y1 = epm_forward(x, weight, bias, ln_gamma, ln_beta, gate_res,
                     heads=heads, causal=False)
    # 2) causal, without gate_res (specialized kernel: no gate_res input at all)
    y2 = epm_forward(x, weight, bias, ln_gamma, ln_beta, None,
                     heads=heads, causal=True)

    # Config B: batch=2, seq=16, dim=64, heads=2 (multi-head path).
    B2, N2, D2, H2 = 2, 16, 64, 2
    x2 = jax.random.normal(kx2, (B2, N2, D2), jnp.float32)
    weight2 = jax.random.normal(kw2, (H2, N2, N2), jnp.float32) * 0.1
    bias2 = 1.0 + 0.05 * jax.random.normal(kb2, (H2, N2), jnp.float32)
    ln_gamma2 = 1.0 + 0.1 * jax.random.normal(kg2, (D2,), jnp.float32)
    ln_beta2 = 0.1 * jax.random.normal(kbt2, (D2,), jnp.float32)

    y3 = epm_forward(x2, weight2, bias2, ln_gamma2, ln_beta2, None,
                     heads=H2, causal=False)

    jax.block_until_ready((y1, y2, y3))

    r1 = _reference(x, weight, bias, ln_gamma, ln_beta, gate_res,
                    heads=heads, causal=False)
    r2 = _reference(x, weight, bias, ln_gamma, ln_beta, None,
                    heads=heads, causal=True)
    r3 = _reference(x2, weight2, bias2, ln_gamma2, ln_beta2, None,
                    heads=H2, causal=False)

    assert jnp.allclose(y1, r1, atol=1e-4, rtol=1e-4), \
        float(jnp.max(jnp.abs(y1 - r1)))
    assert jnp.allclose(y2, r2, atol=1e-4, rtol=1e-4), \
        float(jnp.max(jnp.abs(y2 - r2)))
    assert jnp.allclose(y3, r3, atol=1e-4, rtol=1e-4), \
        float(jnp.max(jnp.abs(y3 - r3)))

    print("KERNEL_OK")
</pallas_src>

<mosaic_0001>
module attributes {stable_mosaic.version = 11 : i64} {
  func.func @_epm_kernel(%arg0: i32, %arg1: i32, %arg2: memref<1x8x32xf32, #tpu.memory_space<vmem>>, %arg3: memref<1x32xf32, #tpu.memory_space<vmem>>, %arg4: memref<1x32xf32, #tpu.memory_space<vmem>>, %arg5: memref<1x8x8xf32, #tpu.memory_space<vmem>>, %arg6: memref<8x1xf32, #tpu.memory_space<vmem>>, %arg7: memref<1x8x32xf32, #tpu.memory_space<vmem>>, %arg8: memref<1x8x32xf32, #tpu.memory_space<vmem>>, %arg9: memref<1x8x32xf32, #tpu.memory_space<vmem>>) attributes {dimension_semantics = [#tpu.dimension_semantics<parallel>, #tpu.dimension_semantics<arbitrary>], iteration_bounds = array<i64: 2, 1>, scalar_prefetch = 0 : i64, scratch_operands = 1 : i64, tpu.core_type = #tpu.core_type<tc>, window_params = [{transform_indices = @transform_0, window_bounds = array<i64: 1, 8, 32>}, {pipeline_mode = #tpu.pipeline_mode<synchronous>, transform_indices = @transform_1, window_bounds = array<i64: 1, 32>}, {pipeline_mode = #tpu.pipeline_mode<synchronous>, transform_indices = @transform_2, window_bounds = array<i64: 1, 32>}, {transform_indices = @transform_3, window_bounds = array<i64: 1, 8, 8>}, {transform_indices = @transform_4, window_bounds = array<i64: 8, 1>}, {transform_indices = @transform_5, window_bounds = array<i64: 1, 8, 32>}, {transform_indices = @transform_6, window_bounds = array<i64: 1, 8, 32>}]} {
    %c0_i32 = arith.constant 0 : i32
    %0 = arith.cmpi eq, %arg1, %c0_i32 : i32
    %1 = arith.extui %0 : i1 to i32
    %c0_i32_0 = arith.constant 0 : i32
    %2 = arith.cmpi ne, %1, %c0_i32_0 : i32
    scf.if %2 {
      %c0_17 = arith.constant 0 : index
      %c0_18 = arith.constant 0 : index
      %c0_19 = arith.constant 0 : index
      %20 = vector.load %arg2[%c0_17, %c0_18, %c0_19] : memref<1x8x32xf32, #tpu.memory_space<vmem>>, vector<1x8x32xf32>
      %21 = vector.shape_cast %20 : vector<1x8x32xf32> to vector<8x32xf32>
      %cst_20 = arith.constant dense<0.000000e+00> : vector<8xf32>
      %22 = vector.multi_reduction <add>, %21, %cst_20 [1] : vector<8x32xf32> to vector<8xf32>
      %23 = vector.shape_cast %22 : vector<8xf32> to vector<8x1xf32>
      %cst_21 = arith.constant 3.200000e+01 : f32
      %24 = vector.broadcast %cst_21 : f32 to vector<8x1xf32>
      %25 = arith.divf %23, %24 : vector<8x1xf32>
      %26 = vector.broadcast %25 : vector<8x1xf32> to vector<8x32xf32>
      %27 = arith.subf %21, %26 : vector<8x32xf32>
      %28 = arith.mulf %27, %27 : vector<8x32xf32>
      %cst_22 = arith.constant dense<0.000000e+00> : vector<8xf32>
      %29 = vector.multi_reduction <add>, %28, %cst_22 [1] : vector<8x32xf32> to vector<8xf32>
      %30 = vector.shape_cast %29 : vector<8xf32> to vector<8x1xf32>
      %cst_23 = arith.constant 3.200000e+01 : f32
      %31 = vector.broadcast %cst_23 : f32 to vector<8x1xf32>
      %32 = arith.divf %30, %31 : vector<8x1xf32>
      %cst_24 = arith.constant 9.99999974E-6 : f32
      %33 = vector.broadcast %cst_24 : f32 to vector<8x1xf32>
      %34 = arith.addf %32, %33 : vector<8x1xf32>
      %35 = math.rsqrt %34 : vector<8x1xf32>
      %36 = vector.broadcast %35 : vector<8x1xf32> to vector<8x32xf32>
      %37 = arith.mulf %27, %36 : vector<8x32xf32>
      %c0_25 = arith.constant 0 : index
      %c0_26 = arith.constant 0 : index
      %38 = vector.load %arg3[%c0_25, %c0_26] : memref<1x32xf32, #tpu.memory_space<vmem>>, vector<1x32xf32>
      %39 = vector.broadcast %38 : vector<1x32xf32> to vector<8x32xf32>
      %40 = arith.mulf %37, %39 : vector<8x32xf32>
      %c0_27 = arith.constant 0 : index
      %c0_28 = arith.constant 0 : index
      %41 = vector.load %arg4[%c0_27, %c0_28] : memref<1x32xf32, #tpu.memory_space<vmem>>, vector<1x32xf32>
      %42 = vector.broadcast %41 : vector<1x32xf32> to vector<8x32xf32>
      %43 = arith.addf %40, %42 : vector<8x32xf32>
      %c0_29 = arith.constant 0 : index
      %c0_30 = arith.constant 0 : index
      %c0_31 = arith.constant 0 : index
      %44 = vector.load %arg9[%c0_29, %c0_30, %c0_31] : memref<1x8x32xf32, #tpu.memory_space<vmem>>, vector<1x8x32xf32>
      %45 = vector.shape_cast %44 : vector<1x8x32xf32> to vector<8x32xf32>
      %46 = vector.shape_cast %43 : vector<8x32xf32> to vector<1x8x32xf32>
      tpu.vector_store %arg9[%c0_29, %c0_30, %c0_31], %46 {strides = array<i32>} : memref<1x8x32xf32, #tpu.memory_space<vmem>>, vector<1x8x32xf32>,
    } else {
    }
    %c0 = arith.constant 0 : index
    %c0_1 = arith.constant 0 : index
    %c0_2 = arith.constant 0 : index
    %3 = vector.load %arg5[%c0, %c0_1, %c0_2] : memref<1x8x8xf32, #tpu.memory_space<vmem>>, vector<1x8x8xf32>
    %4 = vector.shape_cast %3 : vector<1x8x8xf32> to vector<8x8xf32>
    %c0_3 = arith.constant 0 : index
    %c0_4 = arith.constant 0 : index
    %c0_5 = arith.constant 0 : index
    %5 = vector.load %arg9[%c0_3, %c0_4, %c0_5] : memref<1x8x32xf32, #tpu.memory_space<vmem>>, vector<1x8x32xf32>
    %6 = vector.shape_cast %5 : vector<1x8x32xf32> to vector<8x32xf32>
    %cst = arith.constant dense<0.000000e+00> : vector<8x32xf32>
    %7 = tpu.matmul %4, %6, %cst {dimension_numbers = #tpu.dot_dimension_numbers<[1], [0], [0], [1], [0, 0, 1, 1], [], []>} : vector<8x8xf32>, vector<8x32xf32>, vector<8x32xf32> -> vector<8x32xf32>
    %c0_6 = arith.constant 0 : index
    %c0_7 = arith.constant 0 : index
    %8 = vector.load %arg6[%c0_6, %c0_7] : memref<8x1xf32, #tpu.memory_space<vmem>>, vector<8x1xf32>
    %9 = vector.broadcast %8 : vector<8x1xf32> to vector<8x32xf32>
    %10 = arith.addf %7, %9 : vector<8x32xf32>
    %c0_8 = arith.constant 0 : index
    %c0_9 = arith.constant 0 : index
    %c0_10 = arith.constant 0 : index
    %11 = vector.load %arg7[%c0_8, %c0_9, %c0_10] : memref<1x8x32xf32, #tpu.memory_space<vmem>>, vector<1x8x32xf32>
    %12 = vector.shape_cast %11 : vector<1x8x32xf32> to vector<8x32xf32>
    %13 = arith.addf %10, %12 : vector<8x32xf32>
    %c0_11 = arith.constant 0 : index
    %c0_12 = arith.constant 0 : index
    %c0_13 = arith.constant 0 : index
    %14 = vector.load %arg2[%c0_11, %c0_12, %c0_13] : memref<1x8x32xf32, #tpu.memory_space<vmem>>, vector<1x8x32xf32>
    %15 = vector.shape_cast %14 : vector<1x8x32xf32> to vector<8x32xf32>
    %16 = arith.mulf %13, %15 : vector<8x32xf32>
    %c0_14 = arith.constant 0 : index
    %c0_15 = arith.constant 0 : index
    %c0_16 = arith.constant 0 : index
    %17 = vector.load %arg8[%c0_14, %c0_15, %c0_16] : memref<1x8x32xf32, #tpu.memory_space<vmem>>, vector<1x8x32xf32>
    %18 = vector.shape_cast %17 : vector<1x8x32xf32> to vector<8x32xf32>
    %19 = vector.shape_cast %16 : vector<8x32xf32> to vector<1x8x32xf32>
    tpu.vector_store %arg8[%c0_14, %c0_15, %c0_16], %19 {strides = array<i32>} : memref<1x8x32xf32, #tpu.memory_space<vmem>>, vector<1x8x32xf32>,
    return
  }
  func.func @transform_0(%arg0: i32, %arg1: i32) -> (i32, i32, i32) {
    %c0_i32 = arith.constant 0 : i32
    %c0_i32_0 = arith.constant 0 : i32
    %c0_i32_1 = arith.constant 0 : i32
    return %arg0, %c0_i32, %c0_i32_0 : i32, i32, i32
  }
  func.func @transform_1(%arg0: i32, %arg1: i32) -> (i32, i32) {
    %c0_i32 = arith.constant 0 : i32
    %c0_i32_0 = arith.constant 0 : i32
    %c0_i32_1 = arith.constant 0 : i32
    return %c0_i32, %c0_i32_0 : i32, i32
  }
  func.func @transform_2(%arg0: i32, %arg1: i32) -> (i32, i32) {
    %c0_i32 = arith.constant 0 : i32
    %c0_i32_0 = arith.constant 0 : i32
    %c0_i32_1 = arith.constant 0 : i32
    return %c0_i32, %c0_i32_0 : i32, i32
  }
  func.func @transform_3(%arg0: i32, %arg1: i32) -> (i32, i32, i32) {
    %c0_i32 = arith.constant 0 : i32
    %c0_i32_0 = arith.constant 0 : i32
    %c0_i32_1 = arith.constant 0 : i32
    return %c0_i32, %arg1, %c0_i32_0 : i32, i32, i32
  }
  func.func @transform_4(%arg0: i32, %arg1: i32) -> (i32, i32) {
    %c0_i32 = arith.constant 0 : i32
    %c0_i32_0 = arith.constant 0 : i32
    return %arg1, %c0_i32 : i32, i32
  }
  func.func @transform_5(%arg0: i32, %arg1: i32) -> (i32, i32, i32) {
    %c0_i32 = arith.constant 0 : i32
    %c0_i32_0 = arith.constant 0 : i32
    return %arg0, %arg1, %c0_i32 : i32, i32, i32
  }
  func.func @transform_6(%arg0: i32, %arg1: i32) -> (i32, i32, i32) {
    %c0_i32 = arith.constant 0 : i32
    %c0_i32_0 = arith.constant 0 : i32
    return %arg0, %arg1, %c0_i32 : i32, i32, i32
  }
}

</mosaic_0001>

<bundles_post_ra>
// kernel: tpu_custom_call.1
= control target key start
LH: loop header
LB: loop body
LE: loop exit
PB: predicated region body
PF: predicated region fallthrough
CT: control target
= control target key end

     0   :  { %s1078_s0 = inlined_call_operand.hbm [shape: f32[2,8,32], index: 0, kind: input, shape index: {}]   ;;  %s1079_s1 = inlined_call_operand.vmem [shape: f32[1,32], index: 1, kind: input, shape index: {}]   ;;  %s1080_s2 = inlined_call_operand.vmem [shape: f32[1,32], index: 2, kind: input, shape index: {}]   ;;  %s1081_s3 = inlined_call_operand.hbm [shape: f32[1,8,8], index: 3, kind: input, shape index: {}]   ;;  %s1082_s4 = inlined_call_operand.vmem [shape: f32[8,1], index: 4, kind: input, shape index: {}]   ;;  %s1083_s5 = inlined_call_operand.vmem [shape: f32[2,8,32], index: 5, kind: input, shape index: {}]   ;;  %s1084_s6 = inlined_call_operand.hbm [shape: f32[2,8,32], index: 6, kind: output, shape index: {}]  }
   0x1   :  { %1087 = sst [smem:[#allocation13_spill]] %s1081_s3 }
   0x2   :  { %11 = vsyncpa [#allocation4], 0 }
   0x3   :  { %13 = vsyncpa [#allocation4 + $0x1], 0 }
   0x4   :  { %14 = vsyncpa [#allocation7], 0 }
   0x5   :  { %15 = vsyncpa [#allocation5], 0 }
   0x6   :  { %17 = vsyncpa [#allocation5 + $0x1], 0  ;;  %s895_s21 = smov 0   ;;  %s897_s22 = smov 0  }
   0x7   :  { %s899_s23 = smov 0   ;;  %s901_s24 = smov 0  }
   0x8   :  { %s903_s25 = smov 0   ;;  %s905_s26 = smov 0  }
   0x9 LB: > { %s607_s27 = sadd.s32 4294967295, %s852_s26   ;;  %s608_s28 = sadd.s32 4294967294, %s852_s26   ;;  %s852_s26 = sphi %s905_s26, %s23_s26   ;;  %s848_s25 = sphi %s903_s25, %s1106_s25   ;;  %s844_s24 = sphi %s901_s24, %s1105_s24   ;;  %s840_s23 = sphi %s899_s23, %s1104_s23   ;;  %s836_s22 = sphi %s897_s22, %s1103_s22   ;;  %s832_s21 = sphi %s895_s21, %s1102_s21  }
   0xa   : > { %p55_p0 = scmp.ne.s32.totalorder %s836_s22, %s832_s21  ;;  %p929_p1 = scmp.eq.s32.totalorder %s607_s27, 0 }
   0xb   : > { %p933_p2 = scmp.eq.s32.totalorder %s607_s27, 1  ;;  %p209_p3 = scmp.eq.s32.totalorder %s608_s28, 1 }
   0xc   : > { %p939_p4 = por %p929_p1, %p55_p0  ;;  %p609_p5 = scmp.ge.s32.totalorder %s852_s26, 1 }
   0xd   : > { %p944_p6 = por %p209_p3, %p55_p0  ;;  %p216_p7 = scmp.lt.s32.totalorder %s852_s26, 3 }
   0xe   : > { %s1090_s7 = scalar_select %p939_p4, 1, 0 }
   0xf   : > { %s1091_s8 = scalar_select %p944_p6, 1, 0 }
  0x10   : > { %p949_p8 = pnand %p609_p5, %p216_p7  ;;  %s854_s10 = smov [#allocation6]  }
  0x11   : > { %s237_s11 = sshll.u32 %s854_s10, 4  ;;  %s35_s13 = sadd.s32 1, %s848_s25  ;;  %s238_s11 = int_to_ptr.vmem [resolvable:$true] %s237_s11 }
  0x12   : > { %p642_p10 = pneg %p949_p8  ;;  %s42_s14 = sadd.s32 1, %s840_s23 }
  0x13   : > { %p37_p12 = scmp.ge.s32.totalorder %s35_s13, 2  ;;  %s725_s15 = scalar_lea.vmem %s238_s11, 128 }
  0x14   : > { %p958_p11 = pnand %p642_p10, %p929_p1  ;;  %p726_p0 = scmp.ne.s32.totalorder %s238_s11, %s725_s15 }
  0x15   : > { %p733_p7 = scmp.lt.s32.totalorder %s238_s11, %s238_s11  ;;  %p734_p6 = scmp.lt.s32.totalorder %s725_s15, %s725_s15 }
  0x16   : > { %p716_p13 = pneg %p958_p11 }
  0x17   : > { %p735_p9 = por %p734_p6, %p733_p7 }
  0x18   : > { %p728_p3 = pnand %p726_p0, %p716_p13 }
  0x1a   : > { %p729_p5 = pneg %p728_p3 }
  0x1c   : > { %p736_p4 = pnand %p735_p9, %p729_p5 }
  0x1e   : > { %739 = shalt.err (!%p736_p4)
}
  0x1f   : > { %s1094_s3 = sld [smem:[#allocation13_spill]]  ;;  %s1108_s13 = smov (%p37_p12, %s35_s13), 0 }
  0x20   : > { %1095 = sst [smem:[#allocation12_spill]] %s1108_s13  ;;  %p49_p6 = scmp.ne.s32.totalorder %s840_s23, %s836_s22 }
  0x21   : > { %p50_p4 = scmp.eq.s32.totalorder %s852_s26, 0  ;;  %s39_s18 = ssub.s32 %s848_s25, %s1108_s13 }
  0x22   : > { %p655_p9 = scmp.lt.s32.totalorder %s852_s26, 2  ;;  %p40_p10 = scmp.eq.s32.totalorder %s39_s18, 0 }
  0x23   : > { %p51_p13 = por %p50_p4, %p49_p6  ;;  %p981_p0 = por %p933_p2, %p49_p6 }
  0x24   : > { %s255_s20 = sand.u32 1, %s840_s23   ;;  %s614_s10 = sshll.u32 %s848_s25, 7 }
  0x25   : > { %645 = dma.hbm_to_vmem [thread:$0]  (!%p958_p11), %s1094_s3, 128, %s238_s11, [#allocation7]  }
  0x26   : > { %s987_s27 = scalar_select %p40_p10, %s840_s23, %s42_s14  }
  0x27   : > { %s613_s28 = sshll.u32 %s255_s20, 3  ;;  %s264_s15 = scalar_lea.hbm %s1078_s0, %s614_s10 }
  0x28   : > { %s259_s16 = scalar_lea.vmem [#allocation3], %s613_s28  ;;  %p993_p11 = pnand %p655_p9, %p51_p13 }
  0x29   : > { %s266_s17 = sshll.u32 %s259_s16, 4  ;;  %s256_s30 = scalar_lea.sflag [#allocation4], %s255_s20  ;;  %s267_s17 = int_to_ptr.vmem [resolvable:$true] %s266_s17 }
  0x2a   : > { %p742_p2 = pneg %p993_p11  ;;  %s753_s3 = scalar_lea.vmem %s267_s17, 128 }
  0x2b   : > { %p754_p12 = scmp.ne.s32.totalorder %s267_s17, %s753_s3  ;;  %s855_s14 = smov [#allocation3]  }
  0x2c   : > { %s758_s13 = sshll.u32 %s855_s14, 4  ;;  %s759_s13 = int_to_ptr.vmem [resolvable:$false] %s758_s13 }
  0x2d   : > { %p756_p3 = pnand %p754_p12, %p742_p2  ;;  %s760_s11 = scalar_lea.vmem %s759_s13, 256 }
  0x2e   : > { %p761_p7 = scmp.lt.s32.totalorder %s267_s17, %s759_s13  ;;  %p762_p6 = scmp.lt.s32.totalorder %s760_s11, %s753_s3 }
  0x2f   : > { %p757_p5 = pneg %p756_p3 }
  0x30   : > { %p763_p4 = por %p762_p6, %p761_p7 }
  0x32   : > { %p764_p10 = pnand %p763_p4, %p757_p5 }
  0x34   : > { %767 = shalt.err (!%p764_p10)
}
  0x35   : > { %649 = dma.hbm_to_vmem [thread:$0]  (!%p993_p11), %s264_s15, 128, %s267_s17, %s256_s30  }
  0x36   : > { %285 = sbr.rel (%p949_p8) target bundleno = 592 (0x250), region = 44  ;;  %s1004_s20 = sand.u32 (!%p949_p8), 1, %s836_s22  }
  0x37   : > { %s616_s28 = sshll.u32 (!%p949_p8), %s1004_s20, 3  ;;  %s288_s10 = scalar_lea.sflag (!%p949_p8), [#allocation4], %s1004_s20 }
  0x38   : > { %s291_s3 = scalar_lea.vmem (!%p949_p8), [#allocation3], %s616_s28  ;;  %p1098_p9 = scmp.ne.s32.totalorder (!%p949_p8), %s1090_s7, 0 }
  0x3b   : > { %819 = dma.done.wait (%p1098_p9), %s288_s10, 128  }
  0x3c   : > { %821 = vsyncadd (%p1098_p9), %s288_s10, 4294967168 }
  0x3d   : > { %823 = dma.done.wait (%p929_p1), [#allocation7], 128  }
  0x3e   : > { %825 = vsyncadd (%p929_p1), [#allocation7], 4294967168  ;;  %vm351_vm0 = vcmask 261120   ;;  %v350_v0 = vld [vmem:[%s291_s3] sm:$0xff]  ;;  %v856_v7 = vmov 0.0   ;;  %vm857_vm1 = vmmov 0  }
  0x3f   : > { %v352_v1 = vsel %vm351_vm0, %v350_v0, 0.0  ;;  %629 = vmatprep.subr.mxu0 %v856_v7  ;;  %631 = vmatprep.mubr.msk.f32.mxu0 %vm857_vm1, %v856_v7  ;;  %v385_v8 = vld [vmem:[%s1082_s4] sm:$0xff]  ;;  %v858_v9 = vmov 0   ;;  %v383_v19 = vld [vmem:[#allocation6] sm:$0xff]  ;;  %vm391_vm2 = vcmask 64512   ;;  %p339_p1 = scmp.lt.s32.totalorder %s844_s24, 1 }
  0x40   : > { %353 = vadd.xlane.f32.xlu0 %v352_v1  ;;  %710 = vset.pattern.permute.xlu1 %v858_v9  ;;  %v620_v14 = vld [vmem:[%s1079_s1] ss:$0 sm:$0xff]  ;;  %s624_s11 = sshll.u32 %s844_s24, 7  ;;  %s334_s10 = scalar_lea.vmem [#allocation8], %s616_s28 }
  0x41   : > { %711 = vset.pattern.permute.xlu0 %v858_v9  ;;  %388 = vperm.xlu1 %710, %v385_v8   ;;  %v621_v16 = vld [vmem:[%s1080_s2] ss:$0 sm:$0xff]  ;;  %s340_s16 = scalar_select %p339_p1, %s844_s24, 1 }
  0x42   : > { %s486_s3 = sshll.u32 %s334_s10, 4  ;;  %s484_s29 = scalar_lea.hbm %s1084_s6, %s624_s11  ;;  %s487_s3 = int_to_ptr.vmem [resolvable:$true] %s486_s3 }
  0x43   : > { %s619_s17 = sshll.u32 %s340_s16, 3  ;;  %s472_s13 = scalar_lea.sflag [#allocation5], %s1004_s20 }
  0x44   : > { %s345_s14 = scalar_lea.vmem %s1083_s5, %s619_s17  ;;  %s768_s12 = scalar_lea.vmem %s487_s3, 128 }
  0x45   : > { %v465_v23 = vld [vmem:[%s345_s14] sm:$0xff]  ;;  %p769_p8 = scmp.ne.s32.totalorder %s487_s3, %s768_s12  ;;  %s859_s15 = smov [#allocation8]  }
  0x46   : > { %s772_s24 = sshll.u32 %s859_s15, 4  ;;  %s773_s24 = int_to_ptr.vmem [resolvable:$false] %s772_s24 }
  0x47   : > { %p770_p13 = pnand %p769_p8, %p981_p0  ;;  %s774_s28 = scalar_lea.vmem %s773_s24, 256 }
  0x48   : > { %p775_p2 = scmp.lt.s32.totalorder %s487_s3, %s773_s24  ;;  %p776_p12 = scmp.lt.s32.totalorder %s774_s28, %s768_s12 }
  0x49   : > { %p771_p11 = pneg %p770_p13 }
  0x4a   : > { %p777_p3 = por %p776_p12, %p775_p2 }
  0x4c   : > { %p778_p5 = pnand %p777_p3, %p771_p11 }
  0xbc   : > { %v389_v21 = vpop.permute.xlu1 %388 }
  0xc9   : > { %v354_v2 = vpop.xlane.xlu0 %353 }
  0xca   : > { %v356_v3 = vmul.f32 0.03125, %v354_v2 }
  0xcc   : > { %v357_v4 = vsub.f32 %v350_v0, %v356_v3 }
  0xce   : > { %v358_v5 = vmul.f32 %v357_v4, %v357_v4 }
  0xd0   : > { %v359_v6 = vsel %vm351_vm0, %v358_v5, 0.0 }
  0xd1   : > { %360 = vadd.xlane.f32.xlu0 %v359_v6 }
 0x15a   : > { %v361_v10 = vpop.xlane.xlu0 %360 }
 0x15b   : > { %v362_v11 = vmul.f32 0.03125, %v361_v10 }
 0x15d   : > { %v363_v12 = vadd.f32 1e-05, %v362_v11 }
 0x15f   : > { %712 = vrsqrt.f32 %v363_v12 }
 0x16c   : > { %v713_v13 = vpop.eup %712 }
 0x16d   : > { %v365_v15 = vmul.f32 %v713_v13, %v357_v4 }
 0x16f   : > { %v373_v17 = vmul.f32 %v620_v14, %v365_v15 }
 0x171   : > { %v381_v18 = vadd.f32 %v621_v16, %v373_v17 }
 0x173   : > { %382 = vst.msk [vmem:[#allocation2] sm:$0xff] %vm351_vm0, %v381_v18 }
 0x17a   : > { %v384_v20 = vld [vmem:[#allocation2] sm:$0xff] }
 0x17b   : > { %630 = vmatpush3.msra.mxu0 %v384_v20 }
 0x17c   : > { %632 = vmatmul.mubr.msk.f32.vlgmr.msra.gmra.mxu0 %vm391_vm2, %v383_v19 }
 0x23c   : > { %v461_v22 = vpop.f32.mrf.mxu0 }
 0x23d   : > { %v462_v24 = vadd.f32 %v461_v22, %v389_v21 }
 0x23e   : > { %v633_v25 = vpop.f32.mrf.mxu0 }
 0x23f   : > { %v466_v26 = vadd.f32 %v465_v23, %v462_v24 }
 0x241   : > { %v468_v27 = vmul.f32 %v466_v26, %v350_v0 }
 0x243   : > { %470 = vst.msk [vmem:[%s334_s10] sm:$0xff] %vm351_vm0, %v468_v27 }
 0x244   : > { %781 = shalt.err (!%p778_p5)
}
 0x245   : > { %s782_s16 = scalar_lea.hbm %s484_s29, 128  ;;  %s786_s18 = scalar_lea.hbm %s1084_s6, 256 }
 0x246   : > { %p783_p7 = scmp.ne.s32.totalorder %s484_s29, %s782_s16  ;;  %p787_p10 = scmp.lt.s32.totalorder %s484_s29, %s1084_s6 }
 0x247   : > { %p788_p9 = scmp.lt.s32.totalorder %s786_s18, %s782_s16 }
 0x248   : > { %p784_p6 = pnand %p783_p7, %p981_p0 }
 0x249   : > { %p789_p1 = por %p788_p9, %p787_p10 }
 0x24a   : > { %p785_p4 = pneg %p784_p6 }
 0x24c   : > { %p790_p8 = pnand %p789_p1, %p785_p4 }
 0x24e   : > { %793 = shalt.err (!%p790_p8)
}
 0x24f   : > { %640 = dma.vmem_to_hbm [thread:$0]  (%p981_p0), %s487_s3, 128, %s484_s29, %s472_s13  }
 0x250 PF: > { %s498_s11 = sand.u32 1, %s832_s21   ;;  %p1099_p13 = scmp.ne.s32.totalorder %s1091_s8, 0 }
 0x251   : > { %p1100_p11 = scmp.ge.s32.totalorder %s852_s26, 2  ;;  %s499_s10 = scalar_lea.sflag [#allocation5], %s498_s11 }
 0x253   : > { %p651_p2 = pnand %p1100_p11, %p1099_p13 }
 0x255   : > { %p652_p12 = pneg %p651_p2 }
 0x257   : > { %827 = dma.done.wait (%p652_p12), %s499_s10, 128  }
 0x258   : > { %829 = vsyncadd (%p652_p12), %s499_s10, 4294967168  ;;  %s23_s26 = sadd.s32 1, %s852_s26   ;;  %s1101_s19 = sld [smem:[#allocation12_spill]] }
 0x259   : > { %p20_p3 = scmp.ge.s32.totalorder %s23_s26, 4   ;;  %s1102_s21 = smov %s836_s22 }
 0x25a   : > { %s1103_s22 = smov %s840_s23  ;;  %s1104_s23 = smov %s987_s27 }
 0x25b   : > { %s1105_s24 = smov %s848_s25  ;;  %22 = sbr.rel (!%p20_p3) target bundleno = 9 (0x9), region = 104 }
 0x25e   : > { %s1106_s25 = smov %s1101_s19 }
 0x260   :  { %504 = vsyncpa [#allocation4], 1 }
 0x261   :  { %506 = vsyncpa [#allocation4 + $0x1], 1 }
 0x262   :  { %507 = vsyncpa [#allocation7], 1 }
 0x263   :  { %508 = vsyncpa [#allocation5], 1 }
 0x264   :  { %510 = vsyncpa [#allocation5 + $0x1], 1 }

</bundles_post_ra>
